<compile_context>
chip_gen: v5e
topology: v5e:2x2
jax: 0.10.0
libtpu: 0.0.40
codegen_flags: <defaults>
</compile_context>

<pallas_src>
import numpy as np
import jax
import jax.numpy as jnp
from jax import lax
from jax.experimental import pallas as pl
from jax.experimental.pallas import tpu as pltpu

LN_EPS = 1e-5                      # nn.LayerNorm default
_SUB = 16                          # sublane granularity safe for f32 and bf16
_VMEM_BUDGET = 40 * 1024 * 1024    # target footprint for tile sizing
_VMEM_LIMIT = 48 * 1024 * 1024     # above 16/32 MiB scoped defaults, < v7x 64 MiB


def _round_up(x, m):
    return ((x + m - 1) // m) * m


def pick_pack_factor(out_dim, target_lanes=256):
    """Rows packed per output row so stores are a lane-dense multiple of 128."""
    if out_dim % 128 == 0:
        return 1
    for target in (target_lanes, 128):
        if target % out_dim == 0:
            return target // out_dim
    # TODO(synk): out_dim dividing neither 128 nor 256 falls back to unpacked
    # (<128-lane, masked) stores.
    return 1


def pack_params(params, *, p, io_dtype=jnp.bfloat16):
    """One-time packing (call at init, not per forward): block-diagonal
    weights, lane-tiled bias/gamma/beta (f32), and factorized group-averaging
    matrices for the in-kernel grouped LayerNorm."""
    w1, b1, g1, be1, w2, b2, g2, be2 = params
    neck_dim = w1.shape[1]
    out_dim = w2.shape[1]

    def bdiag(w):
        w = jnp.asarray(w)
        w = w if p == 1 else jnp.kron(jnp.eye(p, dtype=w.dtype), w)
        return w.astype(io_dtype)

    def rowvec(v):
        v = jnp.asarray(v, jnp.float32).reshape(1, -1)
        return v if p == 1 else jnp.tile(v, (1, p))

    gdim = max(8, p)  # pad the tiny per-group axis up to a sublane tile

    def seg_mats(group_size):
        width = p * group_size
        col = jnp.arange(width) // group_size
        seg = jnp.zeros((width, gdim), jnp.float32)
        seg = seg.at[jnp.arange(width), col].set(1.0 / group_size)   # average
        bcast = jnp.zeros((gdim, width), jnp.float32)
        bcast = bcast.at[col, jnp.arange(width)].set(1.0)            # broadcast
        return seg, bcast

    s1, c1 = seg_mats(neck_dim)
    s2, c2 = seg_mats(out_dim)
    return (bdiag(w1), rowvec(b1), rowvec(g1), rowvec(be1), s1, c1,
            bdiag(w2), rowvec(b2), rowvec(g2), rowvec(be2), s2, c2)


def _group_layer_norm(x, seg, bcast, gamma, beta):
    """LayerNorm over each contiguous group of lanes.  Mean/var are computed
    with two tiny MXU matmuls (average onto a per-group column, then broadcast
    back across the group's lanes); rsqrt runs on the narrow per-group array."""
    mu_g = jnp.dot(x, seg, preferred_element_type=jnp.float32)
    mu = jnp.dot(mu_g, bcast, preferred_element_type=jnp.float32)
    d = x - mu
    var_g = jnp.dot(d * d, seg, preferred_element_type=jnp.float32)
    inv_g = lax.rsqrt(var_g + LN_EPS)
    inv = jnp.dot(inv_g, bcast, preferred_element_type=jnp.float32)
    return d * inv * gamma + beta


def resmlp_kernel(x1_ref, x2_ref,
                  w1_ref, b1_ref, g1_ref, be1_ref, s1_ref, c1_ref,
                  w2_ref, b2_ref, g2_ref, be2_ref, s2_ref, c2_ref,
                  o_ref):
    # Linear(in -> neck): native-dtype operands straight to the MXU, f32 acc.
    h = jnp.dot(x2_ref[...], w1_ref[...], preferred_element_type=jnp.float32)
    h = h + b1_ref[...]
    h = _group_layer_norm(h, s1_ref[...], c1_ref[...], g1_ref[...], be1_ref[...])
    h = jnp.maximum(h, 0.0)

    # Linear(neck -> out): activations cast to the weight dtype (no-op for f32).
    y = jnp.dot(h.astype(w2_ref.dtype), w2_ref[...],
                preferred_element_type=jnp.float32)
    y = y + b2_ref[...]
    y = _group_layer_norm(y, s2_ref[...], c2_ref[...], g2_ref[...], be2_ref[...])

    # Residual + ReLU, lane-dense store.
    o_ref[...] = jnp.maximum(x1_ref[...].astype(jnp.float32) + y,
                             0.0).astype(o_ref.dtype)


def resmlp_forward(x1, x2, packed, *, p, tm=4096, out_dtype=None):
    """x1: [N, out_dim] residual, x2: [N, in_dim]; `packed` from pack_params."""
    (w1, b1, g1, be1, s1, c1, w2, b2, g2, be2, s2, c2) = packed
    N, in_dim = x2.shape
    out_dim = x1.shape[1]
    assert w1.shape[0] == p * in_dim and w2.shape[1] == p * out_dim, \
        "packed params do not match p / input dims"
    if out_dtype is None:
        out_dtype = x1.dtype

    # Pad only to a multiple of p (<= p-1 rows, and only when needed); the
    # ragged row tail of the grid is handled by pl.cdiv + Pallas masking.
    if N % p:
        pad = p - N % p
        x1 = jnp.pad(x1, ((0, pad), (0, 0)))
        x2 = jnp.pad(x2, ((0, pad), (0, 0)))
    rows = x1.shape[0] // p
    out_w, in_w, neck_w = p * out_dim, p * in_dim, w1.shape[1]

    # Lane packing: contiguous reshapes, free.
    x1p = x1.reshape(rows, out_w)
    x2p = x2.reshape(rows, in_w)

    # Row-tile selection: big tiles to amortize per-step overhead, clamped to
    # the VMEM budget and to keep >= ~8 parallel grid steps (v7x megacore).
    out_isz = np.dtype(out_dtype).itemsize

    def vmem_est(t):
        io = 2 * t * (in_w * x2p.dtype.itemsize
                      + out_w * (x1p.dtype.itemsize + out_isz))   # dbl-buffered
        interm = 4 * t * (2 * neck_w + 4 * out_w)                 # f32 h/y/temps
        return io + interm + (2 << 20)

    tm = min(tm, _round_up(rows, _SUB))
    tm = min(tm, max(512, _round_up(pl.cdiv(rows, 8), _SUB)))
    tm = max(_SUB, _round_up(tm, _SUB))
    while vmem_est(tm) > _VMEM_BUDGET and tm > _SUB:
        tm = max(_SUB, _round_up(tm // 2, _SUB))

    grid = (pl.cdiv(rows, tm),)

    def row_spec(width):
        return pl.BlockSpec((tm, width), lambda i: (i, 0))

    def full_spec(a):
        return pl.BlockSpec(a.shape, lambda i: (0, 0))

    outp = pl.pallas_call(
        resmlp_kernel,
        out_shape=jax.ShapeDtypeStruct((rows, out_w), out_dtype),
        grid_spec=pltpu.PrefetchScalarGridSpec(
            num_scalar_prefetch=0,
            grid=grid,
            in_specs=[
                row_spec(out_w),          # x1 (packed residual)
                row_spec(in_w),           # x2 (packed input)
                full_spec(w1), full_spec(b1), full_spec(g1), full_spec(be1),
                full_spec(s1), full_spec(c1),
                full_spec(w2), full_spec(b2), full_spec(g2), full_spec(be2),
                full_spec(s2), full_spec(c2),
            ],
            out_specs=row_spec(out_w),
        ),
        compiler_params=pltpu.CompilerParams(
            dimension_semantics=("parallel",),
            vmem_limit_bytes=_VMEM_LIMIT),
    )(x1p, x2p, w1, b1, g1, be1, s1, c1, w2, b2, g2, be2, s2, c2)

    out = outp.reshape(rows * p, out_dim)
    return out[:N] if rows * p != N else out


# ----------------------------- reference ------------------------------------
def _layer_norm_ref(x, gamma, beta):
    mu = jnp.mean(x, axis=-1, keepdims=True)
    var = jnp.mean((x - mu) * (x - mu), axis=-1, keepdims=True)
    return (x - mu) * lax.rsqrt(var + LN_EPS) * gamma + beta


def resmlp_reference(x1, x2, params):
    w1, b1, g1, be1, w2, b2, g2, be2 = params
    h = x2 @ w1 + b1
    h = jnp.maximum(_layer_norm_ref(h, g1, be1), 0.0)
    y = _layer_norm_ref(h @ w2 + b2, g2, be2)
    return jnp.maximum(x1 + y, 0.0)


def init_params(key, in_dim, out_dim, expand=0.25):
    neck_dim = int(expand * out_dim)
    k1, k2, k3, k4 = jax.random.split(key, 4)
    w1 = jax.random.normal(k1, (in_dim, neck_dim), jnp.float32) / in_dim ** 0.5
    b1 = jax.random.normal(k2, (1, neck_dim), jnp.float32) * 0.01
    g1 = jnp.ones((1, neck_dim), jnp.float32)
    be1 = jnp.zeros((1, neck_dim), jnp.float32)
    w2 = jax.random.normal(k3, (neck_dim, out_dim), jnp.float32) / neck_dim ** 0.5
    b2 = jax.random.normal(k4, (1, out_dim), jnp.float32) * 0.01
    g2 = jnp.ones((1, out_dim), jnp.float32)
    be2 = jnp.zeros((1, out_dim), jnp.float32)
    return (w1, b1, g1, be1, w2, b2, g2, be2)


if __name__ == "__main__":
    # Small shapes consistent with ResMLP(in_dim=32, out_dim=64, expand=0.25).
    N, in_dim, out_dim = 8, 32, 64
    key = jax.random.PRNGKey(0)
    kx1, kx2, kp = jax.random.split(key, 3)
    x1 = jax.random.normal(kx1, (N, out_dim), jnp.float32)
    x2 = jax.random.normal(kx2, (N, in_dim), jnp.float32)
    params = init_params(kp, in_dim, out_dim)
    ref = resmlp_reference(x1, x2, params)

    p = pick_pack_factor(out_dim)          # 4 -> 256-lane packed output rows

    # f32 I/O path.  LN statistics run on the MXU, so the tolerance covers TPU
    # default (non-HIGHEST) matmul precision for f32 operands.
    packed32 = pack_params(params, p=p, io_dtype=jnp.float32)
    out32 = jax.block_until_ready(resmlp_forward(x1, x2, packed32, p=p))
    assert out32.shape == ref.shape, (out32.shape, ref.shape)
    assert jnp.allclose(out32, ref, atol=3e-2, rtol=3e-2), "f32 path mismatch"

    # bf16 I/O fast path (halved HBM traffic; kernel LN math stays f32).
    x1b, x2b = x1.astype(jnp.bfloat16), x2.astype(jnp.bfloat16)
    packed16 = pack_params(params, p=p, io_dtype=jnp.bfloat16)
    out16 = jax.block_until_ready(resmlp_forward(x1b, x2b, packed16, p=p))
    refb = resmlp_reference(x1b.astype(jnp.float32), x2b.astype(jnp.float32), params)
    assert out16.shape == refb.shape, (out16.shape, refb.shape)
    assert jnp.allclose(out16.astype(jnp.float32), refb, atol=8e-2, rtol=8e-2), \
        "bf16 path mismatch"

    print("KERNEL_OK")
</pallas_src>

<mosaic_0001>
module attributes {stable_mosaic.version = 11 : i64} {
  func.func @resmlp_kernel(%arg0: i32, %arg1: memref<16x256xf32, #tpu.memory_space<vmem>>, %arg2: memref<16x128xf32, #tpu.memory_space<vmem>>, %arg3: memref<128x64xf32, #tpu.memory_space<vmem>>, %arg4: memref<1x64xf32, #tpu.memory_space<vmem>>, %arg5: memref<1x64xf32, #tpu.memory_space<vmem>>, %arg6: memref<1x64xf32, #tpu.memory_space<vmem>>, %arg7: memref<64x8xf32, #tpu.memory_space<vmem>>, %arg8: memref<8x64xf32, #tpu.memory_space<vmem>>, %arg9: memref<64x256xf32, #tpu.memory_space<vmem>>, %arg10: memref<1x256xf32, #tpu.memory_space<vmem>>, %arg11: memref<1x256xf32, #tpu.memory_space<vmem>>, %arg12: memref<1x256xf32, #tpu.memory_space<vmem>>, %arg13: memref<256x8xf32, #tpu.memory_space<vmem>>, %arg14: memref<8x256xf32, #tpu.memory_space<vmem>>, %arg15: memref<16x256xf32, #tpu.memory_space<vmem>>) attributes {dimension_semantics = [#tpu.dimension_semantics<parallel>], iteration_bounds = array<i64: 1>, scalar_prefetch = 0 : i64, scratch_operands = 0 : i64, tpu.core_type = #tpu.core_type<tc>, window_params = [{transform_indices = @transform_0, window_bounds = array<i64: 16, 256>}, {transform_indices = @transform_1, window_bounds = array<i64: 16, 128>}, {pipeline_mode = #tpu.pipeline_mode<synchronous>, transform_indices = @transform_2, window_bounds = array<i64: 128, 64>}, {pipeline_mode = #tpu.pipeline_mode<synchronous>, transform_indices = @transform_3, window_bounds = array<i64: 1, 64>}, {pipeline_mode = #tpu.pipeline_mode<synchronous>, transform_indices = @transform_4, window_bounds = array<i64: 1, 64>}, {pipeline_mode = #tpu.pipeline_mode<synchronous>, transform_indices = @transform_5, window_bounds = array<i64: 1, 64>}, {pipeline_mode = #tpu.pipeline_mode<synchronous>, transform_indices = @transform_6, window_bounds = array<i64: 64, 8>}, {pipeline_mode = #tpu.pipeline_mode<synchronous>, transform_indices = @transform_7, window_bounds = array<i64: 8, 64>}, {pipeline_mode = #tpu.pipeline_mode<synchronous>, transform_indices = @transform_8, window_bounds = array<i64: 64, 256>}, {pipeline_mode = #tpu.pipeline_mode<synchronous>, transform_indices = @transform_9, window_bounds = array<i64: 1, 256>}, {pipeline_mode = #tpu.pipeline_mode<synchronous>, transform_indices = @transform_10, window_bounds = array<i64: 1, 256>}, {pipeline_mode = #tpu.pipeline_mode<synchronous>, transform_indices = @transform_11, window_bounds = array<i64: 1, 256>}, {pipeline_mode = #tpu.pipeline_mode<synchronous>, transform_indices = @transform_12, window_bounds = array<i64: 256, 8>}, {pipeline_mode = #tpu.pipeline_mode<synchronous>, transform_indices = @transform_13, window_bounds = array<i64: 8, 256>}, {transform_indices = @transform_14, window_bounds = array<i64: 16, 256>}]} {
    %c0 = arith.constant 0 : index
    %c0_0 = arith.constant 0 : index
    %0 = vector.load %arg2[%c0, %c0_0] : memref<16x128xf32, #tpu.memory_space<vmem>>, vector<16x128xf32>
    %c0_1 = arith.constant 0 : index
    %c0_2 = arith.constant 0 : index
    %1 = vector.load %arg3[%c0_1, %c0_2] : memref<128x64xf32, #tpu.memory_space<vmem>>, vector<128x64xf32>
    %cst = arith.constant dense<0.000000e+00> : vector<16x64xf32>
    %2 = tpu.matmul %0, %1, %cst {dimension_numbers = #tpu.dot_dimension_numbers<[1], [0], [0], [1], [0, 0, 1, 1], [], []>} : vector<16x128xf32>, vector<128x64xf32>, vector<16x64xf32> -> vector<16x64xf32>
    %c0_3 = arith.constant 0 : index
    %c0_4 = arith.constant 0 : index
    %3 = vector.load %arg4[%c0_3, %c0_4] : memref<1x64xf32, #tpu.memory_space<vmem>>, vector<1x64xf32>
    %4 = vector.broadcast %3 : vector<1x64xf32> to vector<16x64xf32>
    %5 = arith.addf %2, %4 : vector<16x64xf32>
    %c0_5 = arith.constant 0 : index
    %c0_6 = arith.constant 0 : index
    %6 = vector.load %arg7[%c0_5, %c0_6] : memref<64x8xf32, #tpu.memory_space<vmem>>, vector<64x8xf32>
    %c0_7 = arith.constant 0 : index
    %c0_8 = arith.constant 0 : index
    %7 = vector.load %arg8[%c0_7, %c0_8] : memref<8x64xf32, #tpu.memory_space<vmem>>, vector<8x64xf32>
    %c0_9 = arith.constant 0 : index
    %c0_10 = arith.constant 0 : index
    %8 = vector.load %arg5[%c0_9, %c0_10] : memref<1x64xf32, #tpu.memory_space<vmem>>, vector<1x64xf32>
    %c0_11 = arith.constant 0 : index
    %c0_12 = arith.constant 0 : index
    %9 = vector.load %arg6[%c0_11, %c0_12] : memref<1x64xf32, #tpu.memory_space<vmem>>, vector<1x64xf32>
    %cst_13 = arith.constant dense<0.000000e+00> : vector<16x8xf32>
    %10 = tpu.matmul %5, %6, %cst_13 {dimension_numbers = #tpu.dot_dimension_numbers<[1], [0], [0], [1], [0, 0, 1, 1], [], []>} : vector<16x64xf32>, vector<64x8xf32>, vector<16x8xf32> -> vector<16x8xf32>
    %cst_14 = arith.constant dense<0.000000e+00> : vector<16x64xf32>
    %11 = tpu.matmul %10, %7, %cst_14 {dimension_numbers = #tpu.dot_dimension_numbers<[1], [0], [0], [1], [0, 0, 1, 1], [], []>} : vector<16x8xf32>, vector<8x64xf32>, vector<16x64xf32> -> vector<16x64xf32>
    %12 = arith.subf %5, %11 : vector<16x64xf32>
    %13 = arith.mulf %12, %12 : vector<16x64xf32>
    %cst_15 = arith.constant dense<0.000000e+00> : vector<16x8xf32>
    %14 = tpu.matmul %13, %6, %cst_15 {dimension_numbers = #tpu.dot_dimension_numbers<[1], [0], [0], [1], [0, 0, 1, 1], [], []>} : vector<16x64xf32>, vector<64x8xf32>, vector<16x8xf32> -> vector<16x8xf32>
    %cst_16 = arith.constant 9.99999974E-6 : f32
    %15 = vector.broadcast %cst_16 : f32 to vector<16x8xf32>
    %16 = arith.addf %14, %15 : vector<16x8xf32>
    %17 = math.rsqrt %16 : vector<16x8xf32>
    %cst_17 = arith.constant dense<0.000000e+00> : vector<16x64xf32>
    %18 = tpu.matmul %17, %7, %cst_17 {dimension_numbers = #tpu.dot_dimension_numbers<[1], [0], [0], [1], [0, 0, 1, 1], [], []>} : vector<16x8xf32>, vector<8x64xf32>, vector<16x64xf32> -> vector<16x64xf32>
    %19 = arith.mulf %12, %18 : vector<16x64xf32>
    %20 = vector.broadcast %8 : vector<1x64xf32> to vector<16x64xf32>
    %21 = arith.mulf %19, %20 : vector<16x64xf32>
    %22 = vector.broadcast %9 : vector<1x64xf32> to vector<16x64xf32>
    %23 = arith.addf %21, %22 : vector<16x64xf32>
    %cst_18 = arith.constant 0.000000e+00 : f32
    %24 = vector.broadcast %cst_18 : f32 to vector<16x64xf32>
    %25 = arith.maximumf %23, %24 : vector<16x64xf32>
    %c0_19 = arith.constant 0 : index
    %c0_20 = arith.constant 0 : index
    %26 = vector.load %arg9[%c0_19, %c0_20] : memref<64x256xf32, #tpu.memory_space<vmem>>, vector<64x256xf32>
    %cst_21 = arith.constant dense<0.000000e+00> : vector<16x256xf32>
    %27 = tpu.matmul %25, %26, %cst_21 {dimension_numbers = #tpu.dot_dimension_numbers<[1], [0], [0], [1], [0, 0, 1, 1], [], []>} : vector<16x64xf32>, vector<64x256xf32>, vector<16x256xf32> -> vector<16x256xf32>
    %c0_22 = arith.constant 0 : index
    %c0_23 = arith.constant 0 : index
    %28 = vector.load %arg10[%c0_22, %c0_23] : memref<1x256xf32, #tpu.memory_space<vmem>>, vector<1x256xf32>
    %29 = vector.broadcast %28 : vector<1x256xf32> to vector<16x256xf32>
    %30 = arith.addf %27, %29 : vector<16x256xf32>
    %c0_24 = arith.constant 0 : index
    %c0_25 = arith.constant 0 : index
    %31 = vector.load %arg13[%c0_24, %c0_25] : memref<256x8xf32, #tpu.memory_space<vmem>>, vector<256x8xf32>
    %c0_26 = arith.constant 0 : index
    %c0_27 = arith.constant 0 : index
    %32 = vector.load %arg14[%c0_26, %c0_27] : memref<8x256xf32, #tpu.memory_space<vmem>>, vector<8x256xf32>
    %c0_28 = arith.constant 0 : index
    %c0_29 = arith.constant 0 : index
    %33 = vector.load %arg11[%c0_28, %c0_29] : memref<1x256xf32, #tpu.memory_space<vmem>>, vector<1x256xf32>
    %c0_30 = arith.constant 0 : index
    %c0_31 = arith.constant 0 : index
    %34 = vector.load %arg12[%c0_30, %c0_31] : memref<1x256xf32, #tpu.memory_space<vmem>>, vector<1x256xf32>
    %cst_32 = arith.constant dense<0.000000e+00> : vector<16x8xf32>
    %35 = tpu.matmul %30, %31, %cst_32 {dimension_numbers = #tpu.dot_dimension_numbers<[1], [0], [0], [1], [0, 0, 1, 1], [], []>} : vector<16x256xf32>, vector<256x8xf32>, vector<16x8xf32> -> vector<16x8xf32>
    %cst_33 = arith.constant dense<0.000000e+00> : vector<16x256xf32>
    %36 = tpu.matmul %35, %32, %cst_33 {dimension_numbers = #tpu.dot_dimension_numbers<[1], [0], [0], [1], [0, 0, 1, 1], [], []>} : vector<16x8xf32>, vector<8x256xf32>, vector<16x256xf32> -> vector<16x256xf32>
    %37 = arith.subf %30, %36 : vector<16x256xf32>
    %38 = arith.mulf %37, %37 : vector<16x256xf32>
    %cst_34 = arith.constant dense<0.000000e+00> : vector<16x8xf32>
    %39 = tpu.matmul %38, %31, %cst_34 {dimension_numbers = #tpu.dot_dimension_numbers<[1], [0], [0], [1], [0, 0, 1, 1], [], []>} : vector<16x256xf32>, vector<256x8xf32>, vector<16x8xf32> -> vector<16x8xf32>
    %cst_35 = arith.constant 9.99999974E-6 : f32
    %40 = vector.broadcast %cst_35 : f32 to vector<16x8xf32>
    %41 = arith.addf %39, %40 : vector<16x8xf32>
    %42 = math.rsqrt %41 : vector<16x8xf32>
    %cst_36 = arith.constant dense<0.000000e+00> : vector<16x256xf32>
    %43 = tpu.matmul %42, %32, %cst_36 {dimension_numbers = #tpu.dot_dimension_numbers<[1], [0], [0], [1], [0, 0, 1, 1], [], []>} : vector<16x8xf32>, vector<8x256xf32>, vector<16x256xf32> -> vector<16x256xf32>
    %44 = arith.mulf %37, %43 : vector<16x256xf32>
    %45 = vector.broadcast %33 : vector<1x256xf32> to vector<16x256xf32>
    %46 = arith.mulf %44, %45 : vector<16x256xf32>
    %47 = vector.broadcast %34 : vector<1x256xf32> to vector<16x256xf32>
    %48 = arith.addf %46, %47 : vector<16x256xf32>
    %c0_37 = arith.constant 0 : index
    %c0_38 = arith.constant 0 : index
    %49 = vector.load %arg1[%c0_37, %c0_38] : memref<16x256xf32, #tpu.memory_space<vmem>>, vector<16x256xf32>
    %50 = arith.addf %49, %48 : vector<16x256xf32>
    %cst_39 = arith.constant 0.000000e+00 : f32
    %51 = vector.broadcast %cst_39 : f32 to vector<16x256xf32>
    %52 = arith.maximumf %50, %51 : vector<16x256xf32>
    %c0_40 = arith.constant 0 : index
    %c0_41 = arith.constant 0 : index
    %53 = vector.load %arg15[%c0_40, %c0_41] : memref<16x256xf32, #tpu.memory_space<vmem>>, vector<16x256xf32>
    tpu.vector_store %arg15[%c0_40, %c0_41], %52 {strides = array<i32>} : memref<16x256xf32, #tpu.memory_space<vmem>>, vector<16x256xf32>,
    return
  }
  func.func @transform_0(%arg0: i32) -> (i32, i32) {
    %c0_i32 = arith.constant 0 : i32
    %c0_i32_0 = arith.constant 0 : i32
    return %arg0, %c0_i32 : i32, i32
  }
  func.func @transform_1(%arg0: i32) -> (i32, i32) {
    %c0_i32 = arith.constant 0 : i32
    %c0_i32_0 = arith.constant 0 : i32
    return %arg0, %c0_i32 : i32, i32
  }
  func.func @transform_2(%arg0: i32) -> (i32, i32) {
    %c0_i32 = arith.constant 0 : i32
    %c0_i32_0 = arith.constant 0 : i32
    %c0_i32_1 = arith.constant 0 : i32
    return %c0_i32, %c0_i32_0 : i32, i32
  }
  func.func @transform_3(%arg0: i32) -> (i32, i32) {
    %c0_i32 = arith.constant 0 : i32
    %c0_i32_0 = arith.constant 0 : i32
    %c0_i32_1 = arith.constant 0 : i32
    return %c0_i32, %c0_i32_0 : i32, i32
  }
  func.func @transform_4(%arg0: i32) -> (i32, i32) {
    %c0_i32 = arith.constant 0 : i32
    %c0_i32_0 = arith.constant 0 : i32
    %c0_i32_1 = arith.constant 0 : i32
    return %c0_i32, %c0_i32_0 : i32, i32
  }
  func.func @transform_5(%arg0: i32) -> (i32, i32) {
    %c0_i32 = arith.constant 0 : i32
    %c0_i32_0 = arith.constant 0 : i32
    %c0_i32_1 = arith.constant 0 : i32
    return %c0_i32, %c0_i32_0 : i32, i32
  }
  func.func @transform_6(%arg0: i32) -> (i32, i32) {
    %c0_i32 = arith.constant 0 : i32
    %c0_i32_0 = arith.constant 0 : i32
    %c0_i32_1 = arith.constant 0 : i32
    return %c0_i32, %c0_i32_0 : i32, i32
  }
  func.func @transform_7(%arg0: i32) -> (i32, i32) {
    %c0_i32 = arith.constant 0 : i32
    %c0_i32_0 = arith.constant 0 : i32
    %c0_i32_1 = arith.constant 0 : i32
    return %c0_i32, %c0_i32_0 : i32, i32
  }
  func.func @transform_8(%arg0: i32) -> (i32, i32) {
    %c0_i32 = arith.constant 0 : i32
    %c0_i32_0 = arith.constant 0 : i32
    %c0_i32_1 = arith.constant 0 : i32
    return %c0_i32, %c0_i32_0 : i32, i32
  }
  func.func @transform_9(%arg0: i32) -> (i32, i32) {
    %c0_i32 = arith.constant 0 : i32
    %c0_i32_0 = arith.constant 0 : i32
    %c0_i32_1 = arith.constant 0 : i32
    return %c0_i32, %c0_i32_0 : i32, i32
  }
  func.func @transform_10(%arg0: i32) -> (i32, i32) {
    %c0_i32 = arith.constant 0 : i32
    %c0_i32_0 = arith.constant 0 : i32
    %c0_i32_1 = arith.constant 0 : i32
    return %c0_i32, %c0_i32_0 : i32, i32
  }
  func.func @transform_11(%arg0: i32) -> (i32, i32) {
    %c0_i32 = arith.constant 0 : i32
    %c0_i32_0 = arith.constant 0 : i32
    %c0_i32_1 = arith.constant 0 : i32
    return %c0_i32, %c0_i32_0 : i32, i32
  }
  func.func @transform_12(%arg0: i32) -> (i32, i32) {
    %c0_i32 = arith.constant 0 : i32
    %c0_i32_0 = arith.constant 0 : i32
    %c0_i32_1 = arith.constant 0 : i32
    return %c0_i32, %c0_i32_0 : i32, i32
  }
  func.func @transform_13(%arg0: i32) -> (i32, i32) {
    %c0_i32 = arith.constant 0 : i32
    %c0_i32_0 = arith.constant 0 : i32
    %c0_i32_1 = arith.constant 0 : i32
    return %c0_i32, %c0_i32_0 : i32, i32
  }
  func.func @transform_14(%arg0: i32) -> (i32, i32) {
    %c0_i32 = arith.constant 0 : i32
    %c0_i32_0 = arith.constant 0 : i32
    return %arg0, %c0_i32 : i32, i32
  }
}

</mosaic_0001>

<bundles_post_ra>
// kernel: tpu_custom_call.1
= control target key start
LH: loop header
LB: loop body
LE: loop exit
PB: predicated region body
PF: predicated region fallthrough
CT: control target
= control target key end

     0   :  { %19 = vsyncpa [#allocation3], 0  ;;  %vm104_vm0 = vcmask 523264   ;;  %vm134_vm1 = vcmask 64512   ;;  %vm630_vm14 = vcmask 1041408   ;;  %vm632_vm15 = vcmask 1043458   ;;  %s1265_s0 = inlined_call_operand.vmem [shape: f32[2,256], index: 0, kind: input, shape index: {}]   ;;  %s1266_s1 = inlined_call_operand.vmem [shape: f32[2,128], index: 1, kind: input, shape index: {}]   ;;  %s1267_s2 = inlined_call_operand.vmem [shape: f32[128,64], index: 2, kind: input, shape index: {}]   ;;  %s1268_s3 = inlined_call_operand.vmem [shape: f32[1,64], index: 3, kind: input, shape index: {}]   ;;  %s1269_s4 = inlined_call_operand.vmem [shape: f32[1,64], index: 4, kind: input, shape index: {}]   ;;  %s1270_s5 = inlined_call_operand.vmem [shape: f32[1,64], index: 5, kind: input, shape index: {}]   ;;  %s1271_s6 = inlined_call_operand.vmem [shape: f32[64,8], index: 6, kind: input, shape index: {}]   ;;  %s1272_s7 = inlined_call_operand.vmem [shape: f32[8,64], index: 7, kind: input, shape index: {}]   ;;  %s1273_s8 = inlined_call_operand.vmem [shape: f32[64,256], index: 8, kind: input, shape index: {}]   ;;  %s1274_s9 = inlined_call_operand.vmem [shape: f32[1,256], index: 9, kind: input, shape index: {}]   ;;  %s1275_s10 = inlined_call_operand.vmem [shape: f32[1,256], index: 10, kind: input, shape index: {}]   ;;  %s1276_s11 = inlined_call_operand.vmem [shape: f32[1,256], index: 11, kind: input, shape index: {}]   ;;  %s1277_s12 = inlined_call_operand.vmem [shape: f32[256,8], index: 12, kind: input, shape index: {}]   ;;  %s1278_s13 = inlined_call_operand.vmem [shape: f32[8,256], index: 13, kind: input, shape index: {}]   ;;  %s1279_s14 = inlined_call_operand.hbm [shape: f32[2,256], index: 14, kind: output, shape index: {}]  }
   0x1   :  { %v65_v0 = vld [vmem:[%s1267_s2 + $0x78] sm:$0xff]  ;;  %v64_v1 = vld [vmem:[%s1267_s2 + $0x70] sm:$0xff]  ;;  %v63_v2 = vld [vmem:[%s1267_s2 + $0x68] sm:$0xff] }
   0x2   :  { %70 = vmatpush.msra.mxu0 %v65_v0  ;;  %v62_v3 = vld [vmem:[%s1267_s2 + $0x60] sm:$0xff]  ;;  %v61_v4 = vld [vmem:[%s1267_s2 + $0x58] sm:$0xff]  ;;  %v60_v5 = vld [vmem:[%s1267_s2 + $0x50] sm:$0xff] }
   0x3   :  { %v100_v6 = vld [vmem:[%s1271_s6 + $0x38] sm:$0xff]  ;;  %v99_v7 = vld [vmem:[%s1271_s6 + $0x30] sm:$0xff]  ;;  %v59_v8 = vld [vmem:[%s1267_s2 + $0x48] sm:$0xff] }
   0x4   :  { %71 = vmatpush.msra.mxu0 %v64_v1  ;;  %119 = vmatpush.msra.mxu1 %v100_v6  ;;  %v98_v9 = vld [vmem:[%s1271_s6 + $0x28] sm:$0xff]  ;;  %v58_v10 = vld [vmem:[%s1267_s2 + $0x40] sm:$0xff]  ;;  %v57_v12 = vld [vmem:[%s1267_s2 + $0x38] sm:$0xff] }
   0x5   :  { %182 = vmatpush.msra.mxu3 %v100_v6  ;;  %v97_v11 = vld [vmem:[%s1271_s6 + $0x20] sm:$0xff]  ;;  %v96_v13 = vld [vmem:[%s1271_s6 + $0x18] sm:$0xff]  ;;  %v56_v14 = vld [vmem:[%s1267_s2 + $0x30] sm:$0xff] }
   0x6   :  { %72 = vmatpush.msra.mxu0 %v63_v2  ;;  %120 = vmatpush.msra.mxu1 %v99_v7  ;;  %v95_v15 = vld [vmem:[%s1271_s6 + $0x10] sm:$0xff]  ;;  %v55_v16 = vld [vmem:[%s1267_s2 + $0x28] sm:$0xff]  ;;  %v54_v17 = vld [vmem:[%s1267_s2 + $0x20] sm:$0xff] }
   0x7   :  { %183 = vmatpush.msra.mxu3 %v99_v7  ;;  %v53_v18 = vld [vmem:[%s1267_s2 + $0x18] sm:$0xff]  ;;  %v52_v19 = vld [vmem:[%s1267_s2 + $0x10] sm:$0xff]  ;;  %v51_v20 = vld [vmem:[%s1267_s2 + $0x8] sm:$0xff] }
   0x8   :  { %73 = vmatpush.msra.mxu0 %v62_v3  ;;  %121 = vmatpush.msra.mxu1 %v98_v9  ;;  %v50_v21 = vld [vmem:[%s1267_s2] sm:$0xff]  ;;  %v49_v23 = vld [vmem:[%s1266_s1 + $0x8] sm:$0xff]  ;;  %v274_v40 = vld [vmem:[%s1273_s8 + $0x70] sm:$0xff] }
   0x9   :  { %184 = vmatpush.msra.mxu3 %v98_v9  ;;  %v48_v22 = vld [vmem:[%s1266_s1] sm:$0xff]  ;;  %v94_v24 = vld [vmem:[%s1271_s6 + $0x8] sm:$0xff]  ;;  %v275_v41 = vld [vmem:[%s1273_s8 + $0x78] sm:$0xff] }
   0xa   :  { %74 = vmatpush.msra.mxu0 %v61_v4  ;;  %122 = vmatpush.msra.mxu1 %v97_v11  ;;  %v93_v25 = vld [vmem:[%s1271_s6] sm:$0xff]  ;;  %v273_v43 = vld [vmem:[%s1273_s8 + $0x68] sm:$0xff]  ;;  %v270_v44 = vld [vmem:[%s1273_s8 + $0x50] sm:$0xff] }
   0xb   :  { %185 = vmatpush.msra.mxu3 %v97_v11  ;;  %v722_v26 = vld [vmem:[%s1268_s3] ss:$0 sm:$0xff]  ;;  %v271_v45 = vld [vmem:[%s1273_s8 + $0x58] sm:$0xff]  ;;  %v269_v49 = vld [vmem:[%s1273_s8 + $0x48] sm:$0xff] }
   0xc   :  { %75 = vmatpush.msra.mxu0 %v60_v5  ;;  %123 = vmatpush.msra.mxu1 %v96_v13  ;;  %v101_v31 = vld [vmem:[%s1272_s7] sm:$0xff]  ;;  %v266_v2 = vld [vmem:[%s1273_s8 + $0x30] sm:$0xff]  ;;  %v267_v3 = vld [vmem:[%s1273_s8 + $0x38] sm:$0xff] }
   0xd   :  { %186 = vmatpush.msra.mxu3 %v96_v13  ;;  %156 = vmatpush.msra.mxu2 %v101_v31  ;;  %v272_v42 = vld [vmem:[%s1273_s8 + $0x60] sm:$0xff]  ;;  %v265_v5 = vld [vmem:[%s1273_s8 + $0x28] sm:$0xff]  ;;  %v262_v6 = vld [vmem:[%s1273_s8 + $0x10] sm:$0xff] }
   0xe   :  { %76 = vmatpush.msra.mxu0 %v59_v8  ;;  %124 = vmatpush.msra.mxu1 %v95_v15  ;;  %v268_v48 = vld [vmem:[%s1273_s8 + $0x40] sm:$0xff]  ;;  %v263_v7 = vld [vmem:[%s1273_s8 + $0x18] sm:$0xff]  ;;  %v261_v9 = vld [vmem:[%s1273_s8 + $0x8] sm:$0xff] }
   0xf   :  { %187 = vmatpush.msra.mxu3 %v95_v15  ;;  %238 = vmatpush.msrb.mxu2 %v101_v31  ;;  %v264_v4 = vld [vmem:[%s1273_s8 + $0x20] sm:$0xff]  ;;  %v993_v11 = vld [vmem:[%s1277_s12 + $0x70] sm:$0xff]  ;;  %v1004_v13 = vld [vmem:[%s1277_s12 + $0x68] sm:$0xff] }
  0x10   :  { %77 = vmatpush.msra.mxu0 %v58_v10  ;;  %125 = vmatpush.msra.mxu1 %v94_v24  ;;  %v260_v8 = vld [vmem:[%s1273_s8] sm:$0xff]  ;;  %v988_v10 = vld [vmem:[%s1277_s12 + $0x78] sm:$0xff]  ;;  %v1016_v15 = vld [vmem:[%s1277_s12 + $0xe8] sm:$0xff] }
  0x11   :  { %188 = vmatpush.msra.mxu3 %v94_v24  ;;  %v1069_v24 = vld [vmem:[%s1277_s12 + $0x40] sm:$0xff] }
  0x12   :  { %78 = vmatpush.msra.mxu0 %v57_v12  ;;  %126 = vmatpush.msra.mxu1 %v93_v25  ;;  %v999_v12 = vld [vmem:[%s1277_s12 + $0xf8] sm:$0xff]  ;;  %v724_v31 = vld [vmem:[%s1270_s5] ss:$0 sm:$0xff] }
  0x13   :  { %189 = vmatpush.msra.mxu3 %v93_v25  ;;  %v1076_v25 = vld [vmem:[%s1277_s12 + $0xc0] sm:$0xff] }
  0x14   :  { %79 = vmatpush.msra.mxu0 %v56_v14  ;;  %296 = vmatpush.msrb.mxu1 %v274_v40  ;;  %v1010_v14 = vld [vmem:[%s1277_s12 + $0xf0] sm:$0xff] }
  0x15   :  { %319 = vmatpush.msrb.mxu3 %v275_v41  ;;  %v1131_v41 = vld [vmem:[%s1277_s12 + $0x18] sm:$0xff] }
  0x16   :  { %80 = vmatpush.msra.mxu0 %v55_v16  ;;  %297 = vmatpush.msrb.mxu1 %v272_v42  ;;  %v1021_v16 = vld [vmem:[%s1277_s12 + $0x60] sm:$0xff] }
  0x17   :  { %320 = vmatpush.msrb.mxu3 %v273_v43 }
  0x18   :  { %81 = vmatpush.msra.mxu0 %v54_v17  ;;  %298 = vmatpush.msrb.mxu1 %v270_v44  ;;  %v1028_v17 = vld [vmem:[%s1277_s12 + $0xe0] sm:$0xff]  ;;  %v1141_v44 = vld [vmem:[%s1277_s12 + $0x10] sm:$0xff] }
  0x19   :  { %321 = vmatpush.msrb.mxu3 %v271_v45 }
  0x1a   :  { %82 = vmatpush.msra.mxu0 %v53_v18  ;;  %299 = vmatpush.msrb.mxu1 %v268_v48  ;;  %v1033_v18 = vld [vmem:[%s1277_s12 + $0x58] sm:$0xff]  ;;  %v354_v48 = vld [vmem:[%s1277_s12 + $0xa0] sm:$0xff] }
  0x1b   :  { %322 = vmatpush.msrb.mxu3 %v269_v49  ;;  %v334_v49 = vld [vmem:[%s1277_s12] sm:$0xff] }
  0x1c   :  { %83 = vmatpush.msra.mxu0 %v52_v19  ;;  %300 = vmatpush.msrb.mxu1 %v266_v2  ;;  %v1040_v19 = vld [vmem:[%s1277_s12 + $0xd8] sm:$0xff] }
  0x1d   :  { %323 = vmatpush.msrb.mxu3 %v267_v3 }
  0x1e   :  { %84 = vmatpush.msra.mxu0 %v51_v20  ;;  %301 = vmatpush.msrb.mxu1 %v264_v4  ;;  %v1045_v20 = vld [vmem:[%s1277_s12 + $0x50] sm:$0xff] }
  0x1f   :  { %324 = vmatpush.msrb.mxu3 %v265_v5 }
  0x20   :  { %85 = vmatpush.msra.mxu0 %v50_v21  ;;  %302 = vmatpush.msrb.mxu1 %v262_v6  ;;  %v1052_v21 = vld [vmem:[%s1277_s12 + $0xd0] sm:$0xff] }
  0x21   :  { %86 = vmatmul.f32.vlgmr.msra.gmra.mxu0 %v48_v22  ;;  %325 = vmatpush.msrb.mxu3 %v263_v7  ;;  %v1057_v22 = vld [vmem:[%s1277_s12 + $0x48] sm:$0xff] }
  0x22   :  { %303 = vmatpush.msrb.mxu1 %v260_v8  ;;  %393 = vmatpush.msrb.mxu0 %v999_v12 }
  0x23   :  { %326 = vmatpush.msrb.mxu3 %v261_v9 }
  0x24   :  { %394 = vmatpush.msrb.mxu0 %v1010_v14 }
  0x26   :  { %395 = vmatpush.msrb.mxu0 %v1016_v15 }
  0x28   :  { %396 = vmatpush.msrb.mxu0 %v1028_v17 }
  0x29   :  { %89 = vmatmul.f32.gmra.mxu0 %v49_v23  ;;  %v1064_v23 = vld [vmem:[%s1277_s12 + $0xc8] sm:$0xff] }
  0x2a   :  { %397 = vmatpush.msrb.mxu0 %v1040_v19 }
  0x2c   :  { %398 = vmatpush.msrb.mxu0 %v1052_v21 }
  0x2e   :  { %399 = vmatpush.msrb.mxu0 %v1064_v23 }
  0x30   :  { %400 = vmatpush.msrb.mxu0 %v1076_v25 }
  0x9e   :  { %v87_v27 = vpop.f32.mrf.mxu0 }
  0x9f   :  { %v88_v28 = vadd.f32 %v722_v26, %v87_v27  ;;  %v1084_v27 = vld [vmem:[%s1277_s12 + $0x38] sm:$0xff] }
  0xa1   :  { %698 = vmatmul.msk.f32.vlgmr.msra.gmra.mxu1 %vm104_vm0, %v88_v28 }
  0xa6   :  { %v90_v29 = vpop.f32.mrf.mxu0 }
  0xa7   :  { %v91_v30 = vadd.f32 %v722_v26, %v90_v29  ;;  %v723_v26 = vld [vmem:[%s1269_s4] ss:$0 sm:$0xff]  ;;  %v1091_v29 = vld [vmem:[%s1277_s12 + $0xb8] sm:$0xff] }
  0xa8   :  { %401 = vmatpush.msrb.mxu0 %v1091_v29 }
  0xa9   :  { %699 = vmatmul.msk.f32.gmra.mxu1 %vm104_vm0, %v91_v30 }
 0x11e   :  { %v128_v32 = vpop.f32.mrf.mxu1 }
 0x11f   :  { %700 = vmatmul.msk.f32.vlgmr.msra.gmra.mxu2 %vm134_vm1, %v128_v32  ;;  %v1100_v32 = vld [vmem:[%s1277_s12 + $0x30] sm:$0xff] }
 0x120   :  { %370 = vmatpush.msra.mxu2 %v988_v10 }
 0x122   :  { %371 = vmatpush.msra.mxu2 %v993_v11 }
 0x124   :  { %372 = vmatpush.msra.mxu2 %v1004_v13 }
 0x126   :  { %v131_v33 = vpop.f32.mrf.mxu1  ;;  %373 = vmatpush.msra.mxu2 %v1021_v16 }
 0x127   :  { %701 = vmatmul.msk.f32.gmra.mxu2 %vm134_vm1, %v131_v33  ;;  %v1107_v33 = vld [vmem:[%s1277_s12 + $0xb0] sm:$0xff] }
 0x128   :  { %374 = vmatpush.msra.mxu2 %v1033_v18  ;;  %402 = vmatpush.msrb.mxu0 %v1107_v33 }
 0x12a   :  { %375 = vmatpush.msra.mxu2 %v1045_v20 }
 0x12c   :  { %376 = vmatpush.msra.mxu2 %v1057_v22 }
 0x12e   :  { %377 = vmatpush.msra.mxu2 %v1069_v24 }
 0x130   :  { %378 = vmatpush.msra.mxu2 %v1084_v27 }
 0x132   :  { %379 = vmatpush.msra.mxu2 %v1100_v32 }
 0x1a2   :  { %v158_v34 = vpop.f32.mrf.mxu2 }
 0x1a3   :  { %v925_v35 = vsub.f32 %v88_v28, %v158_v34 }
 0x1a5   :  { %v166_v36 = vmul.f32 %v925_v35, %v925_v35 }
 0x1a7   :  { %702 = vmatmul.msk.f32.vlgmr.msra.gmra.mxu3 %vm104_vm0, %v166_v36  ;;  %v1119_v36 = vld [vmem:[%s1277_s12 + $0xa8] sm:$0xff] }
 0x1a8   :  { %403 = vmatpush.msrb.mxu0 %v1119_v36 }
 0x1aa   :  { %v161_v37 = vpop.f32.mrf.mxu2  ;;  %404 = vmatpush.msrb.mxu0 %v354_v48 }
 0x1ab   :  { %v930_v38 = vsub.f32 %v91_v30, %v161_v37 }
 0x1ad   :  { %v167_v39 = vmul.f32 %v930_v38, %v930_v38 }
 0x1af   :  { %703 = vmatmul.msk.f32.gmra.mxu3 %vm104_vm0, %v167_v39  ;;  %v1124_v39 = vld [vmem:[%s1277_s12 + $0x20] sm:$0xff] }
 0x22a   :  { %v191_v46 = vpop.f32.mrf.mxu3 }
 0x22b   :  { %v192_v47 = vadd.f32 1e-05, %v191_v46 }
 0x22d   :  { %725 = vrsqrt.f32 %v192_v47  ;;  %vm203_vm3 = vweird.f32 %v192_v47 }
 0x232   :  { %v194_v50 = vpop.f32.mrf.mxu3 }
 0x233   :  { %v726_v51 = vpop.eup %725  ;;  %v195_v52 = vadd.f32 1e-05, %v194_v50  ;;  %v353_v50 = vld [vmem:[%s1277_s12 + $0x98] sm:$0xff] }
 0x234   :  { %v198_v53 = vmul.f32 %v726_v51, %v192_v47  ;;  %vm204_vm2 = vweird.f32 %v726_v51  ;;  %405 = vmatpush.msrb.mxu0 %v353_v50 }
 0x235   :  { %727 = vrsqrt.f32 %v195_v52  ;;  %vm205_vm4 = vmor %vm203_vm3, %vm204_vm2  ;;  %vm213_vm6 = vweird.f32 %v195_v52 }
 0x236   :  { %v199_v54 = vmul.f32 %v726_v51, %v198_v53  ;;  %v350_v53 = vld [vmem:[%s1277_s12 + $0x80] sm:$0xff] }
 0x238   :  { %v200_v55 = vmul.f32 0.5, %v199_v54  ;;  %v367_v54 = vld [vmem:[%s1278_s13 + $0x8] sm:$0xff] }
 0x239   :  { %460 = vmatpush.msra.mxu3 %v367_v54 }
 0x23a   :  { %v201_v56 = vsub.f32 1.5, %v200_v55  ;;  %v366_v55 = vld [vmem:[%s1278_s13] sm:$0xff] }
 0x23b   :  { %v728_v57 = vpop.eup %727  ;;  %437 = vmatpush.msra.mxu1 %v366_v55 }
 0x23c   :  { %v208_v58 = vmul.f32 %v728_v57, %v195_v52  ;;  %v202_v59 = vmul.f32 %v726_v51, %v201_v56  ;;  %vm214_vm5 = vweird.f32 %v728_v57  ;;  %v351_v52 = vld [vmem:[%s1277_s12 + $0x88] sm:$0xff]  ;;  %v276_v56 = vld [vmem:[%s1274_s9] sm:$0x3] }
 0x23d   :  { %vm215_vm7 = vmor %vm213_vm6, %vm214_vm5 }
 0x23e   :  { %v209_v60 = vmul.f32 %v728_v57, %v208_v58  ;;  %v206_v61 = vsel %vm205_vm4, %v726_v51, %v202_v59  ;;  %v352_v51 = vld [vmem:[%s1277_s12 + $0x90] sm:$0xff] }
 0x23f   :  { %704 = vmatmul.msk.f32.vlgmr.msrb.gmra.mxu2 %vm134_vm1, %v206_v61  ;;  %406 = vmatpush.msrb.mxu0 %v352_v51 }
 0x240   :  { %v210_v62 = vmul.f32 0.5, %v209_v60  ;;  %v279_v60 = vperm.slane %v276_v56, 1 }
 0x241   :  { %407 = vmatpush.msrb.mxu0 %v351_v52 }
 0x242   :  { %v211_v63 = vsub.f32 1.5, %v210_v62 }
 0x243   :  { %408 = vmatpush.msrb.mxu0 %v350_v53 }
 0x244   :  { %v212_v0 = vmul.f32 %v728_v57, %v211_v63 }
 0x245   :  { %586 = vmatpush.msra.mxu0 %v367_v54 }
 0x246   :  { %v216_v1 = vsel %vm215_vm7, %v728_v57, %v212_v0  ;;  %v278_v57 = vperm.slane %v276_v56, 0 }
 0x247   :  { %705 = vmatmul.msk.f32.gmra.mxu2 %vm134_vm1, %v216_v1 }
 0x2c2   :  { %v240_v28 = vpop.f32.mrf.mxu2 }
 0x2c3   :  { %v246_v30 = vmul.f32 %v240_v28, %v925_v35  ;;  %v1112_v35 = vld [vmem:[%s1277_s12 + $0x28] sm:$0xff] }
 0x2c4   :  { %380 = vmatpush.msra.mxu2 %v1112_v35 }
 0x2c5   :  { %v251_v34 = vmul.f32 %v723_v26, %v246_v30 }
 0x2c6   :  { %381 = vmatpush.msra.mxu2 %v1124_v39 }
 0x2c7   :  { %v256_v37 = vadd.f32 %v724_v31, %v251_v34 }
 0x2c8   :  { %382 = vmatpush.msra.mxu2 %v1131_v41 }
 0x2c9   :  { %v258_v40 = vmax.f32 %v256_v37, 0.0 }
 0x2ca   :  { %v243_v42 = vpop.f32.mrf.mxu2  ;;  %383 = vmatpush.msra.mxu2 %v1141_v44 }
 0x2cb   :  { %v247_v43 = vmul.f32 %v243_v42, %v930_v38  ;;  %706 = vmatmul.msk.f32.vlgmr.msrb.gmra.mxu1 %vm104_vm0, %v258_v40  ;;  %708 = vmatmul.msk.f32.vlgmr.msrb.gmra.mxu3 %vm104_vm0, %v258_v40  ;;  %v1150_v38 = vld [vmem:[%s1277_s12 + $0x8] sm:$0xff] }
 0x2cc   :  { %384 = vmatpush.msra.mxu2 %v1150_v38  ;;  %476 = vmatpush.msrb.mxu1 %v988_v10 }
 0x2cd   :  { %v252_v45 = vmul.f32 %v723_v26, %v247_v43  ;;  %499 = vmatpush.msrb.mxu3 %v999_v12 }
 0x2ce   :  { %385 = vmatpush.msra.mxu2 %v334_v49  ;;  %477 = vmatpush.msrb.mxu1 %v993_v11 }
 0x2cf   :  { %v257_v46 = vadd.f32 %v724_v31, %v252_v45  ;;  %500 = vmatpush.msrb.mxu3 %v1010_v14 }
 0x2d0   :  { %563 = vmatpush.msrb.mxu2 %v366_v55  ;;  %478 = vmatpush.msrb.mxu1 %v1004_v13 }
 0x2d1   :  { %v259_v47 = vmax.f32 %v257_v46, 0.0  ;;  %501 = vmatpush.msrb.mxu3 %v1016_v15  ;;  %v369_v46 = vld [vmem:[%s1276_s11] sm:$0x3] }
 0x2d2   :  { %479 = vmatpush.msrb.mxu1 %v1021_v16 }
 0x2d3   :  { %707 = vmatmul.msk.f32.gmra.mxu1 %vm104_vm0, %v259_v47  ;;  %709 = vmatmul.msk.f32.gmra.mxu3 %vm104_vm0, %v259_v47  ;;  %vm635_vm0 = vcmask 1045508  }
 0x2d4   :  { %502 = vmatpush.msrb.mxu3 %v1028_v17  ;;  %480 = vmatpush.msrb.mxu1 %v1033_v18 }
 0x2d6   :  { %503 = vmatpush.msrb.mxu3 %v1040_v19  ;;  %481 = vmatpush.msrb.mxu1 %v1045_v20 }
 0x2d8   :  { %504 = vmatpush.msrb.mxu3 %v1052_v21  ;;  %482 = vmatpush.msrb.mxu1 %v1057_v22 }
 0x2da   :  { %505 = vmatpush.msrb.mxu3 %v1064_v23  ;;  %483 = vmatpush.msrb.mxu1 %v1069_v24 }
 0x2dc   :  { %506 = vmatpush.msrb.mxu3 %v1076_v25  ;;  %484 = vmatpush.msrb.mxu1 %v1084_v27 }
 0x2de   :  { %507 = vmatpush.msrb.mxu3 %v1091_v29  ;;  %485 = vmatpush.msrb.mxu1 %v1100_v32 }
 0x2e0   :  { %508 = vmatpush.msrb.mxu3 %v1107_v33  ;;  %486 = vmatpush.msrb.mxu1 %v1112_v35 }
 0x2e2   :  { %509 = vmatpush.msrb.mxu3 %v1119_v36  ;;  %487 = vmatpush.msrb.mxu1 %v1124_v39 }
 0x2e4   :  { %510 = vmatpush.msrb.mxu3 %v354_v48  ;;  %488 = vmatpush.msrb.mxu1 %v1131_v41 }
 0x2e6   :  { %511 = vmatpush.msrb.mxu3 %v353_v50  ;;  %489 = vmatpush.msrb.mxu1 %v1141_v44  ;;  %v368_v44 = vld [vmem:[%s1275_s10] sm:$0x3] }
 0x2e7   :  { %v600_v45 = vperm.slane %v368_v44, 1  ;;  %v599_v50 = vperm.slane %v368_v44, 0 }
 0x2e8   :  { %512 = vmatpush.msrb.mxu3 %v352_v51  ;;  %490 = vmatpush.msrb.mxu1 %v1150_v38 }
 0x2ea   :  { %513 = vmatpush.msrb.mxu3 %v351_v52  ;;  %491 = vmatpush.msrb.mxu1 %v334_v49  ;;  %v609_v49 = vperm.slane %v369_v46, 1 }
 0x2ec   :  { %514 = vmatpush.msrb.mxu3 %v350_v53 }
 0x348   :  { %v305_v58 = vpop.f32.mrf.mxu1 }
 0x349   :  { %v306_v59 = vadd.f32 %v305_v58, %v278_v57  ;;  %v616_v58 = vld [vmem:[%s1265_s0] sm:$0xf] }
 0x34b   :  { %386 = vmatmul.f32.vlgmr.msra.gmra.mxu2 %v306_v59 }
 0x34c   :  { %718 = vmatpush.msra.mxu2 %v367_v54  ;;  %v608_v54 = vperm.slane %v369_v46, 0 }
 0x34e   :  { %v328_v61 = vpop.f32.mrf.mxu3 }
 0x34f   :  { %v329_v62 = vadd.f32 %v328_v61, %v279_v60  ;;  %v619_v61 = vld [vmem:[%s1265_s0 + $0xc] sm:$0xf] }
 0x350   :  { %v308_v63 = vpop.f32.mrf.mxu1 }
 0x351   :  { %v309_v0 = vadd.f32 %v308_v63, %v278_v57  ;;  %409 = vmatmul.f32.vlgmr.msrb.gmra.mxu0 %v329_v62 }
 0x353   :  { %389 = vmatmul.f32.gmra.mxu2 %v309_v0 }
 0x356   :  { %v331_v1 = vpop.f32.mrf.mxu3 }
 0x357   :  { %v332_v2 = vadd.f32 %v331_v1, %v279_v60  ;;  %v618_v60 = vld [vmem:[%s1265_s0 + $0x8] sm:$0xf] }
 0x359   :  { %412 = vmatmul.f32.gmra.mxu0 %v332_v2 }
 0x3ce   :  { %v387_v3 = vpop.f32.mrf.mxu2  ;;  %v410_v4 = vpop.f32.mrf.mxu0 }
 0x3cf   :  { %v411_v5 = vadd.f32 %v410_v4, %v387_v3 }
 0x3d1   :  { %710 = vmatmul.msk.f32.vlgmr.msra.gmra.mxu1 %vm134_vm1, %v411_v5  ;;  %712 = vmatmul.msk.f32.vlgmr.msra.gmra.mxu3 %vm134_vm1, %v411_v5 }
 0x3d6   :  { %v390_v6 = vpop.f32.mrf.mxu2  ;;  %v413_v7 = vpop.f32.mrf.mxu0 }
 0x3d7   :  { %v414_v8 = vadd.f32 %v413_v7, %v390_v6 }
 0x3d9   :  { %711 = vmatmul.msk.f32.gmra.mxu1 %vm134_vm1, %v414_v8  ;;  %713 = vmatmul.msk.f32.gmra.mxu3 %vm134_vm1, %v414_v8 }
 0x44e   :  { %v439_v9 = vpop.f32.mrf.mxu1 }
 0x44f   :  { %v468_v10 = vsub.f32 %v306_v59, %v439_v9  ;;  %v617_v59 = vld [vmem:[%s1265_s0 + $0x4] sm:$0xf] }
 0x451   :  { %v472_v11 = vmul.f32 %v468_v10, %v468_v10 }
 0x453   :  { %492 = vmatmul.f32.vlgmr.msrb.gmra.mxu1 %v472_v11 }
 0x454   :  { %v462_v12 = vpop.f32.mrf.mxu3 }
 0x455   :  { %v469_v13 = vsub.f32 %v329_v62, %v462_v12 }
 0x456   :  { %v442_v14 = vpop.f32.mrf.mxu1 }
 0x457   :  { %v473_v15 = vmul.f32 %v469_v13, %v469_v13  ;;  %v1210_v16 = vsub.f32 %v309_v0, %v442_v14 }
 0x459   :  { %515 = vmatmul.f32.vlgmr.msrb.gmra.mxu3 %v473_v15  ;;  %v474_v17 = vmul.f32 %v1210_v16, %v1210_v16 }
 0x45b   :  { %495 = vmatmul.f32.gmra.mxu1 %v474_v17 }
 0x45c   :  { %v465_v18 = vpop.f32.mrf.mxu3 }
 0x45d   :  { %v1214_v19 = vsub.f32 %v332_v2, %v465_v18 }
 0x45f   :  { %v475_v20 = vmul.f32 %v1214_v19, %v1214_v19 }
 0x461   :  { %518 = vmatmul.f32.gmra.mxu3 %v475_v20 }
 0x4d0   :  { %v493_v21 = vpop.f32.mrf.mxu1 }
 0x4d1   :  { %v494_v22 = vadd.f32 1e-05, %v493_v21 }
 0x4d8   :  { %v496_v25 = vpop.f32.mrf.mxu1 }
 0x4d9   :  { %v497_v26 = vadd.f32 1e-05, %v496_v25  ;;  %v621_v25 = vld [vmem:[%s1265_s0 + $0x14] sm:$0xf] }
 0x4dc   :  { %v516_v23 = vpop.f32.mrf.mxu3 }
 0x4dd   :  { %v517_v24 = vadd.f32 %v516_v23, %v494_v22  ;;  %v620_v23 = vld [vmem:[%s1265_s0 + $0x10] sm:$0xf] }
 0x4df   :  { %729 = vrsqrt.f32 %v517_v24  ;;  %vm528_vm9 = vweird.f32 %v517_v24 }
 0x4e4   :  { %v519_v27 = vpop.f32.mrf.mxu3 }
 0x4e5   :  { %v730_v28 = vpop.eup %729  ;;  %v520_v29 = vadd.f32 %v519_v27, %v497_v26 }
 0x4e6   :  { %v523_v30 = vmul.f32 %v730_v28, %v517_v24  ;;  %vm529_vm8 = vweird.f32 %v730_v28 }
 0x4e7   :  { %731 = vrsqrt.f32 %v520_v29  ;;  %vm530_vm10 = vmor %vm528_vm9, %vm529_vm8  ;;  %vm538_vm12 = vweird.f32 %v520_v29 }
 0x4e8   :  { %v524_v31 = vmul.f32 %v730_v28, %v523_v30 }
 0x4ea   :  { %v525_v32 = vmul.f32 0.5, %v524_v31 }
 0x4ec   :  { %v526_v33 = vsub.f32 1.5, %v525_v32 }
 0x4ed   :  { %v732_v34 = vpop.eup %731 }
 0x4ee   :  { %v527_v35 = vmul.f32 %v730_v28, %v526_v33  ;;  %v533_v36 = vmul.f32 %v732_v34, %v520_v29  ;;  %vm539_vm11 = vweird.f32 %v732_v34 }
 0x4ef   :  { %vm540_vm13 = vmor %vm538_vm12, %vm539_vm11 }
 0x4f0   :  { %v534_v37 = vmul.f32 %v732_v34, %v533_v36  ;;  %v531_v39 = vsel %vm530_vm10, %v730_v28, %v527_v35 }
 0x4f1   :  { %714 = vmatmul.msk.f32.vlgmr.msrb.gmra.mxu2 %vm134_vm1, %v531_v39  ;;  %716 = vmatmul.msk.f32.vlgmr.msra.gmra.mxu0 %vm134_vm1, %v531_v39 }
 0x4f2   :  { %v535_v40 = vmul.f32 0.5, %v534_v37 }
 0x4f4   :  { %v536_v41 = vsub.f32 1.5, %v535_v40 }
 0x4f6   :  { %v537_v42 = vmul.f32 %v732_v34, %v536_v41 }
 0x4f8   :  { %v541_v43 = vsel %vm540_vm13, %v732_v34, %v537_v42 }
 0x4f9   :  { %715 = vmatmul.msk.f32.gmra.mxu2 %vm134_vm1, %v541_v43 }
 0x501   :  { %717 = vmatmul.msk.f32.vlgmr.msra.gmra.mxu2 %vm134_vm1, %v541_v43  ;;  %vm638_vm1 = vcmask 1045504  }
 0x56e   :  { %v588_v47 = vpop.f32.mrf.mxu0 }
 0x56f   :  { %v595_v38 = vmul.f32 %v588_v47, %v469_v13 }
 0x571   :  { %v604_v48 = vmul.f32 %v600_v45, %v595_v38 }
 0x573   :  { %v613_v52 = vadd.f32 %v609_v49, %v604_v48 }
 0x574   :  { %v565_v51 = vpop.f32.mrf.mxu2 }
 0x575   :  { %v594_v53 = vmul.f32 %v565_v51, %v468_v10  ;;  %v628_v56 = vrot.slane %v613_v52, 6 }
 0x577   :  { %v603_v55 = vmul.f32 %v599_v50, %v594_v53 }
 0x579   :  { %v612_v57 = vadd.f32 %v608_v54, %v603_v55 }
 0x57b   :  { %v631_v62 = vsel %vm630_vm14, %v612_v57, %v628_v56  ;;  %v633_v63 = vsel %vm632_vm15, %v612_v57, %v628_v56  ;;  %v636_v0 = vsel %vm635_vm0, %v612_v57, %v628_v56  ;;  %v639_v1 = vsel %vm638_vm1, %v628_v56, %v612_v57 }
 0x57c   :  { %v634_v2 = vrot.slane %v633_v63, 2  ;;  %v637_v3 = vrot.slane %v636_v0, 4  ;;  %v640_v4 = vrot.slane %v639_v1, 6  ;;  %v656_v5 = vadd.f32 %v631_v62, %v616_v58  ;;  %v568_v6 = vpop.f32.mrf.mxu2 }
 0x57d   :  { %v596_v14 = vmul.f32 %v568_v6, %v1210_v16  ;;  %v622_v16 = vld [vmem:[%s1265_s0 + $0x18] sm:$0xf] }
 0x57e   :  { %v657_v7 = vadd.f32 %v634_v2, %v617_v59  ;;  %v658_v8 = vadd.f32 %v637_v3, %v618_v60  ;;  %v659_v9 = vadd.f32 %v640_v4, %v619_v61  ;;  %v664_v10 = vmax.f32 %v656_v5, 0.0 }
 0x57f   :  { %v605_v18 = vmul.f32 %v599_v50, %v596_v14 }
 0x580   :  { %v665_v11 = vmax.f32 %v657_v7, 0.0  ;;  %v666_v12 = vmax.f32 %v658_v8, 0.0  ;;  %v667_v13 = vmax.f32 %v659_v9, 0.0  ;;  %672 = vst [vmem:[#allocation2] sm:$0xf] %v664_v10 }
 0x581   :  { %v614_v22 = vadd.f32 %v608_v54, %v605_v18 }
 0x582   :  { %673 = vst [vmem:[#allocation2 + $0x4] sm:$0xf] %v665_v11 }
 0x583   :  { %674 = vst [vmem:[#allocation2 + $0x8] sm:$0xf] %v666_v12 }
 0x584   :  { %675 = vst [vmem:[#allocation2 + $0xc] sm:$0xf] %v667_v13  ;;  %v591_v15 = vpop.f32.mrf.mxu2 }
 0x585   :  { %v597_v17 = vmul.f32 %v591_v15, %v1214_v19  ;;  %v623_v19 = vld [vmem:[%s1265_s0 + $0x1c] sm:$0xf] }
 0x587   :  { %v606_v20 = vmul.f32 %v600_v45, %v597_v17 }
 0x589   :  { %v615_v21 = vadd.f32 %v609_v49, %v606_v20 }
 0x58b   :  { %v629_v24 = vrot.slane %v615_v21, 6 }
 0x58d   :  { %v641_v26 = vsel %vm630_vm14, %v614_v22, %v629_v24  ;;  %v642_v27 = vsel %vm632_vm15, %v614_v22, %v629_v24  ;;  %v644_v28 = vsel %vm635_vm0, %v614_v22, %v629_v24  ;;  %v646_v29 = vsel %vm638_vm1, %v629_v24, %v614_v22 }
 0x58e   :  { %v643_v30 = vrot.slane %v642_v27, 2  ;;  %v645_v31 = vrot.slane %v644_v28, 4  ;;  %v647_v32 = vrot.slane %v646_v29, 6  ;;  %v660_v33 = vadd.f32 %v641_v26, %v620_v23 }
 0x590   :  { %v661_v34 = vadd.f32 %v643_v30, %v621_v25  ;;  %v662_v35 = vadd.f32 %v645_v31, %v622_v16  ;;  %v663_v36 = vadd.f32 %v647_v32, %v623_v19  ;;  %v668_v37 = vmax.f32 %v660_v33, 0.0 }
 0x592   :  { %v669_v39 = vmax.f32 %v661_v34, 0.0  ;;  %v670_v40 = vmax.f32 %v662_v35, 0.0  ;;  %v671_v41 = vmax.f32 %v663_v36, 0.0  ;;  %676 = vst [vmem:[#allocation2 + $0x10] sm:$0xf] %v668_v37 }
 0x594   :  { %677 = vst [vmem:[#allocation2 + $0x14] sm:$0xf] %v669_v39 }
 0x595   :  { %678 = vst [vmem:[#allocation2 + $0x18] sm:$0xf] %v670_v40 }
 0x596   :  { %679 = vst [vmem:[#allocation2 + $0x1c] sm:$0xf] %v671_v41 }
 0x597   :  { %683 = vsyncadd [#allocation3], 448  ;;  %s686_s24 = sshll.u32 %s1279_s14, 4  ;;  %s759_s25 = smov [#allocation2]   ;;  %s687_s24 = int_to_ptr.hbm [resolvable:$true] %s686_s24 }
 0x598   :  { %s684_s26 = sshll.u32 %s759_s25, 4  ;;  %s760_s27 = smov 64   ;;  %s685_s26 = int_to_ptr.vmem [resolvable:$true] %s684_s26 }
 0x599   :  { %s761_s5 = smov 4  }
 0x59a   :  { %692 = dma.vmem_to_hbm [thread:$0]  %s685_s26, 64, %s687_s24, [#allocation3], %s760_s27, %s760_s27, %s761_s5  }
 0x59b   :  { %757 = dma.done.wait [#allocation3], 512  }
 0x59c   :  { %758 = vsyncadd [#allocation3], 4294966784 }
 0x59d   :  { %697 = vsyncpa [#allocation3], 1 }

</bundles_post_ra>
